<compile_context>
chip_gen: v7x
topology: tpu7x:2x2x1
jax: 0.10.0
libtpu: 0.0.40
codegen_flags: <defaults>
</compile_context>

<pallas_src>
import functools

import jax
import jax.numpy as jnp
from jax.experimental import pallas as pl
from jax.experimental.pallas import tpu as pltpu


# ---------------------------------------------------------------------------
# Parameter handling
# ---------------------------------------------------------------------------
def init_params(key, input_dim, hid_dim, mem_dim, dtype=jnp.float32):
    """PyTorch-Linear-style init: U(-1/sqrt(fan_in), 1/sqrt(fan_in))."""
    shapes = {
        "w_inpgate": (input_dim, hid_dim),
        "w_mem_inpgate": (mem_dim, hid_dim),
        "w_inp": (input_dim, hid_dim),
        "w_readgate": (input_dim, mem_dim),
        "w_mem_readgate": (mem_dim, mem_dim),
        "w_decoder": (hid_dim, mem_dim),
        "w_writegate": (input_dim, mem_dim),
        "w_mem_writegate": (mem_dim, mem_dim),
        "w_encoder": (mem_dim, hid_dim),
    }
    params = {}
    for name, (fan_in, fan_out) in shapes.items():
        key, kw, kb = jax.random.split(key, 3)
        bound = 1.0 / jnp.sqrt(jnp.asarray(fan_in, dtype))
        w = jax.random.uniform(kw, (fan_in, fan_out), dtype, -bound, bound)
        b = jax.random.uniform(kb, (fan_out,), dtype, -bound, bound)
        params[name] = (w, b)
    return params


def pack_params(params, input_dim, hid_dim, mem_dim, *, mem_add):
    """Pack the 9 Linear layers into 3 weight slabs + 3 bias rows (done once).

    Column order of the fused gate slab: [inp | inpgate | readgate | writegate],
    the writegate block being dropped when mem_add=True.  The mem-row block of
    the `inp` columns is zero because block_inp only depends on x.
    """
    dt = params["w_inp"][0].dtype
    x_blocks = [params["w_inp"][0], params["w_inpgate"][0], params["w_readgate"][0]]
    m_blocks = [jnp.zeros((mem_dim, hid_dim), dt),
                params["w_mem_inpgate"][0], params["w_mem_readgate"][0]]
    b_blocks = [params["w_inp"][1],
                params["w_inpgate"][1] + params["w_mem_inpgate"][1],
                params["w_readgate"][1] + params["w_mem_readgate"][1]]
    if not mem_add:
        x_blocks.append(params["w_writegate"][0])
        m_blocks.append(params["w_mem_writegate"][0])
        b_blocks.append(params["w_writegate"][1] + params["w_mem_writegate"][1])

    w_gates_x = jnp.concatenate(x_blocks, axis=1)              # (input_dim, Gcols)
    w_gates_m = jnp.concatenate(m_blocks, axis=1)              # (mem_dim,   Gcols)
    w_gates = jnp.concatenate([w_gates_x, w_gates_m], axis=0)  # (in+mem,    Gcols)
    b_gates = jnp.concatenate(b_blocks).reshape(1, -1)

    return dict(
        w_gates=w_gates, b_gates=b_gates,
        w_dec=params["w_decoder"][0], b_dec=params["w_decoder"][1].reshape(1, -1),
        w_enc=params["w_encoder"][0], b_enc=params["w_encoder"][1].reshape(1, -1),
    )


# ---------------------------------------------------------------------------
# Kernel helpers
# ---------------------------------------------------------------------------
def _sigmoid(a):
    # EUP reciprocal (exact) instead of VALU divide.
    return pl.reciprocal(1.0 + jnp.exp(-a), approx=False)


def _elu(a):
    return jnp.where(a > 0, a, jnp.exp(a) - 1.0)


def _cell_body(x_gates, mem, wd, bd, we, be, *, hid_dim, mem_dim, mem_add):
    """Shared gating math given the fused pre-activation `x_gates`."""
    h, m = hid_dim, mem_dim
    block_inp = _elu(x_gates[:, 0:h])
    inp_gate = _sigmoid(x_gates[:, h:2 * h])
    read_gate = _sigmoid(x_gates[:, 2 * h:2 * h + m])

    decoded_mem = jnp.dot(read_gate * mem, wd,
                          preferred_element_type=jnp.float32) + bd
    hidden_act = decoded_mem + block_inp * inp_gate
    encoded_update = _sigmoid(
        jnp.dot(hidden_act, we, preferred_element_type=jnp.float32) + be)

    if mem_add:
        new_mem = mem + encoded_update
    else:
        write_gate = _sigmoid(x_gates[:, 2 * h + m:2 * h + 2 * m])
        new_mem = (1.0 - write_gate) * mem + write_gate * encoded_update
    return hidden_act, new_mem


# ---------------------------------------------------------------------------
# Single-step kernel (matches PT_MMU.forward for one call)
# ---------------------------------------------------------------------------
def _mmu_step_kernel(xm_ref, mem_ref, wg_ref, bg_ref, wd_ref, bd_ref,
                     we_ref, be_ref, out_ref, new_mem_ref,
                     *, hid_dim, mem_dim, mem_add):
    xm = xm_ref[...]          # (B, input_dim + mem_dim), pre-concatenated
    mem = mem_ref[...]

    gates = jnp.dot(xm, wg_ref[...],
                    preferred_element_type=jnp.float32) + bg_ref[...]

    hidden_act, new_mem = _cell_body(
        gates, mem, wd_ref[...], bd_ref[...], we_ref[...], be_ref[...],
        hid_dim=hid_dim, mem_dim=mem_dim, mem_add=mem_add)

    out_ref[...] = hidden_act.astype(out_ref.dtype)
    new_mem_ref[...] = new_mem.astype(new_mem_ref.dtype)


def pt_mmu_forward(x, mem, packed, *, mem_add=False):
    """One MMU step: returns (hidden_act, new_mem), exactly like graph_compute.

    NOTE: `mem` is donated (aliased to the new_mem output buffer); do not reuse
    the passed-in array afterwards.
    """
    B = x.shape[0]
    hid_dim = packed["w_enc"].shape[1]
    mem_dim = mem.shape[1]

    xm = jnp.concatenate([x, mem], axis=1)
    args = (xm, mem, packed["w_gates"], packed["b_gates"],
            packed["w_dec"], packed["b_dec"], packed["w_enc"], packed["b_enc"])

    vmem = pl.BlockSpec(memory_space=pltpu.MemorySpace.VMEM)
    kernel = functools.partial(_mmu_step_kernel, hid_dim=hid_dim,
                               mem_dim=mem_dim, mem_add=mem_add)

    out, new_mem = pl.pallas_call(
        kernel,
        out_shape=(jax.ShapeDtypeStruct((B, hid_dim), x.dtype),
                   jax.ShapeDtypeStruct((B, mem_dim), x.dtype)),
        in_specs=[vmem] * len(args),
        out_specs=(vmem, vmem),
        input_output_aliases={1: 0 + 1},   # mem buffer reused for new_mem
    )(*args)
    return out, new_mem


# ---------------------------------------------------------------------------
# Full-sequence kernel: time loop inside the kernel, grid=(T,)
# weights resident (constant index_map), memory state carried in VMEM.
# ---------------------------------------------------------------------------
def _mmu_seq_kernel(xs_ref, mem0_ref, wgx_ref, wgm_ref, bg_ref,
                    wd_ref, bd_ref, we_ref, be_ref,
                    hid_seq_ref, mem_out_ref,
                    *, hid_dim, mem_dim, mem_add):
    t = pl.program_id(0)

    @pl.when(t == 0)
    def _():
        mem_out_ref[...] = mem0_ref[...]

    x = xs_ref[0]                 # (B, input_dim)
    mem = mem_out_ref[...]        # carried state, VMEM-resident across the grid

    gates = (jnp.dot(x, wgx_ref[...], preferred_element_type=jnp.float32)
             + jnp.dot(mem, wgm_ref[...], preferred_element_type=jnp.float32)
             + bg_ref[...])

    hidden_act, new_mem = _cell_body(
        gates, mem, wd_ref[...], bd_ref[...], we_ref[...], be_ref[...],
        hid_dim=hid_dim, mem_dim=mem_dim, mem_add=mem_add)

    hid_seq_ref[0] = hidden_act.astype(hid_seq_ref.dtype)
    mem_out_ref[...] = new_mem.astype(mem_out_ref.dtype)


def pt_mmu_sequence(xs, mem0, packed, *, mem_add=False):
    """Run T recurrent MMU steps in a single pallas_call."""
    T, B, input_dim = xs.shape
    hid_dim = packed["w_enc"].shape[1]
    mem_dim = mem0.shape[1]

    wgx = packed["w_gates"][:input_dim]     # (input_dim, Gcols)
    wgm = packed["w_gates"][input_dim:]     # (mem_dim,   Gcols)

    const2 = lambda t: (0, 0)
    kernel = functools.partial(_mmu_seq_kernel, hid_dim=hid_dim,
                               mem_dim=mem_dim, mem_add=mem_add)

    hid_seq, mem_final = pl.pallas_call(
        kernel,
        out_shape=(jax.ShapeDtypeStruct((T, B, hid_dim), xs.dtype),
                   jax.ShapeDtypeStruct((B, mem_dim), xs.dtype)),
        grid_spec=pltpu.PrefetchScalarGridSpec(
            num_scalar_prefetch=0,
            grid=(T,),
            in_specs=[
                pl.BlockSpec((1, B, input_dim), lambda t: (t, 0, 0)),
                pl.BlockSpec((B, mem_dim), const2),
                pl.BlockSpec(wgx.shape, const2),
                pl.BlockSpec(wgm.shape, const2),
                pl.BlockSpec(packed["b_gates"].shape, const2),
                pl.BlockSpec(packed["w_dec"].shape, const2),
                pl.BlockSpec(packed["b_dec"].shape, const2),
                pl.BlockSpec(packed["w_enc"].shape, const2),
                pl.BlockSpec(packed["b_enc"].shape, const2),
            ],
            out_specs=(
                pl.BlockSpec((1, B, hid_dim), lambda t: (t, 0, 0)),
                pl.BlockSpec((B, mem_dim), const2),
            ),
        ),
        compiler_params=pltpu.CompilerParams(
            dimension_semantics=("arbitrary",)),   # sequential: state carry
    )(xs, mem0, wgx, wgm, packed["b_gates"], packed["w_dec"], packed["b_dec"],
      packed["w_enc"], packed["b_enc"])
    return hid_seq, mem_final


# ---------------------------------------------------------------------------
# Pure-JAX reference mirroring PT_MMU.graph_compute (unfused weights)
# ---------------------------------------------------------------------------
def _reference_forward(x, mem, params, *, mem_add=False):
    def lin(v, name):
        w, b = params[name]
        return v @ w + b

    block_inp = jax.nn.elu(lin(x, "w_inp"))
    inp_gate = jax.nn.sigmoid(lin(x, "w_inpgate") + lin(mem, "w_mem_inpgate"))
    read_gate = jax.nn.sigmoid(lin(x, "w_readgate") + lin(mem, "w_mem_readgate"))
    decoded_mem = lin(read_gate * mem, "w_decoder")
    hidden_act = decoded_mem + block_inp * inp_gate
    write_gate = jax.nn.sigmoid(lin(x, "w_writegate") + lin(mem, "w_mem_writegate"))
    encoded_update = jax.nn.sigmoid(lin(hidden_act, "w_encoder"))
    if mem_add:
        new_mem = mem + encoded_update
    else:
        new_mem = (1.0 - write_gate) * mem + write_gate * encoded_update
    return hidden_act, new_mem


if __name__ == "__main__":
    # hid_dim == mem_dim is required for the module itself to be shape-consistent.
    batch, input_dim, hid_dim, mem_dim, T = 8, 16, 32, 32, 8

    key = jax.random.PRNGKey(0)
    k_params, k_x, k_seq = jax.random.split(key, 3)
    params = init_params(k_params, input_dim, hid_dim, mem_dim)

    x = jax.random.normal(k_x, (batch, input_dim), jnp.float32)
    xs = jax.random.normal(k_seq, (T, batch, input_dim), jnp.float32)

    # ---- single-step cell, both mem_add modes --------------------------------
    for mem_add in (False, True):
        packed = pack_params(params, input_dim, hid_dim, mem_dim, mem_add=mem_add)

        ref_mem0 = jnp.zeros((batch, mem_dim), jnp.float32)
        ref_out, ref_mem = _reference_forward(x, ref_mem0, params, mem_add=mem_add)

        mem0 = jnp.zeros((batch, mem_dim), jnp.float32)  # donated to the kernel
        out, new_mem = pt_mmu_forward(x, mem0, packed, mem_add=mem_add)
        jax.block_until_ready((out, new_mem))

        assert jnp.allclose(out, ref_out, atol=1e-5, rtol=1e-5)
        assert jnp.allclose(new_mem, ref_mem, atol=1e-5, rtol=1e-5)

    # ---- recurrent sequence: whole time loop inside one kernel ---------------
    mem_add = False
    packed = pack_params(params, input_dim, hid_dim, mem_dim, mem_add=mem_add)
    mem0 = jnp.zeros((batch, mem_dim), jnp.float32)
    hid_seq, mem_final = pt_mmu_sequence(xs, mem0, packed, mem_add=mem_add)
    jax.block_until_ready((hid_seq, mem_final))

    m = jnp.zeros((batch, mem_dim), jnp.float32)
    ref_steps = []
    for t in range(T):
        h_t, m = _reference_forward(xs[t], m, params, mem_add=mem_add)
        ref_steps.append(h_t)
    ref_hid_seq = jnp.stack(ref_steps)

    assert jnp.allclose(hid_seq, ref_hid_seq, atol=1e-4, rtol=1e-4)
    assert jnp.allclose(mem_final, m, atol=1e-4, rtol=1e-4)

    print("KERNEL_OK")
</pallas_src>

<mosaic_0001>
module attributes {stable_mosaic.version = 11 : i64} {
  func.func @_mmu_step_kernel(%arg0: memref<8x48xf32, #tpu.memory_space<vmem>>, %arg1: memref<8x32xf32, #tpu.memory_space<vmem>>, %arg2: memref<48x128xf32, #tpu.memory_space<vmem>>, %arg3: memref<1x128xf32, #tpu.memory_space<vmem>>, %arg4: memref<32x32xf32, #tpu.memory_space<vmem>>, %arg5: memref<1x32xf32, #tpu.memory_space<vmem>>, %arg6: memref<32x32xf32, #tpu.memory_space<vmem>>, %arg7: memref<1x32xf32, #tpu.memory_space<vmem>>, %arg8: memref<8x32xf32, #tpu.memory_space<vmem>>, %arg9: memref<8x32xf32, #tpu.memory_space<vmem>>) attributes {dimension_semantics = [], scalar_prefetch = 0 : i64, scratch_operands = 0 : i64, tpu.core_type = #tpu.core_type<tc>} {
    %c0 = arith.constant 0 : index
    %c0_0 = arith.constant 0 : index
    %0 = vector.load %arg0[%c0, %c0_0] : memref<8x48xf32, #tpu.memory_space<vmem>>, vector<8x48xf32>
    %c0_1 = arith.constant 0 : index
    %c0_2 = arith.constant 0 : index
    %1 = vector.load %arg1[%c0_1, %c0_2] : memref<8x32xf32, #tpu.memory_space<vmem>>, vector<8x32xf32>
    %c0_3 = arith.constant 0 : index
    %c0_4 = arith.constant 0 : index
    %2 = vector.load %arg2[%c0_3, %c0_4] : memref<48x128xf32, #tpu.memory_space<vmem>>, vector<48x128xf32>
    %cst = arith.constant dense<0.000000e+00> : vector<8x128xf32>
    %3 = tpu.matmul %0, %2, %cst {dimension_numbers = #tpu.dot_dimension_numbers<[1], [0], [0], [1], [0, 0, 1, 1], [], []>} : vector<8x48xf32>, vector<48x128xf32>, vector<8x128xf32> -> vector<8x128xf32>
    %c0_5 = arith.constant 0 : index
    %c0_6 = arith.constant 0 : index
    %4 = vector.load %arg3[%c0_5, %c0_6] : memref<1x128xf32, #tpu.memory_space<vmem>>, vector<1x128xf32>
    %5 = vector.broadcast %4 : vector<1x128xf32> to vector<8x128xf32>
    %6 = arith.addf %3, %5 : vector<8x128xf32>
    %c0_7 = arith.constant 0 : index
    %c0_8 = arith.constant 0 : index
    %7 = vector.load %arg4[%c0_7, %c0_8] : memref<32x32xf32, #tpu.memory_space<vmem>>, vector<32x32xf32>
    %c0_9 = arith.constant 0 : index
    %c0_10 = arith.constant 0 : index
    %8 = vector.load %arg5[%c0_9, %c0_10] : memref<1x32xf32, #tpu.memory_space<vmem>>, vector<1x32xf32>
    %c0_11 = arith.constant 0 : index
    %c0_12 = arith.constant 0 : index
    %9 = vector.load %arg6[%c0_11, %c0_12] : memref<32x32xf32, #tpu.memory_space<vmem>>, vector<32x32xf32>
    %c0_13 = arith.constant 0 : index
    %c0_14 = arith.constant 0 : index
    %10 = vector.load %arg7[%c0_13, %c0_14] : memref<1x32xf32, #tpu.memory_space<vmem>>, vector<1x32xf32>
    %11 = vector.extract_strided_slice %6 {offsets = [0, 0], sizes = [8, 32], strides = [1, 1]} : vector<8x128xf32> to vector<8x32xf32>
    %cst_15 = arith.constant 0.000000e+00 : f32
    %12 = vector.broadcast %cst_15 : f32 to vector<8x32xf32>
    %13 = arith.cmpf ogt, %11, %12 : vector<8x32xf32>
    %14 = math.exp %11 : vector<8x32xf32>
    %cst_16 = arith.constant 1.000000e+00 : f32
    %15 = vector.broadcast %cst_16 : f32 to vector<8x32xf32>
    %16 = arith.subf %14, %15 : vector<8x32xf32>
    %17 = arith.select %13, %11, %16 : vector<8x32xi1>, vector<8x32xf32>
    %18 = vector.extract_strided_slice %6 {offsets = [0, 32], sizes = [8, 32], strides = [1, 1]} : vector<8x128xf32> to vector<8x32xf32>
    %cst_17 = arith.constant 0.000000e+00 : f32
    %19 = vector.broadcast %cst_17 : f32 to vector<8x32xf32>
    %20 = arith.subf %19, %18 : vector<8x32xf32>
    %21 = math.exp %20 : vector<8x32xf32>
    %cst_18 = arith.constant 1.000000e+00 : f32
    %22 = vector.broadcast %cst_18 : f32 to vector<8x32xf32>
    %23 = arith.addf %22, %21 : vector<8x32xf32>
    %24 = tpu.reciprocal %23 : vector<8x32xf32> -> vector<8x32xf32>
    %25 = vector.extract_strided_slice %6 {offsets = [0, 64], sizes = [8, 32], strides = [1, 1]} : vector<8x128xf32> to vector<8x32xf32>
    %cst_19 = arith.constant 0.000000e+00 : f32
    %26 = vector.broadcast %cst_19 : f32 to vector<8x32xf32>
    %27 = arith.subf %26, %25 : vector<8x32xf32>
    %28 = math.exp %27 : vector<8x32xf32>
    %cst_20 = arith.constant 1.000000e+00 : f32
    %29 = vector.broadcast %cst_20 : f32 to vector<8x32xf32>
    %30 = arith.addf %29, %28 : vector<8x32xf32>
    %31 = tpu.reciprocal %30 : vector<8x32xf32> -> vector<8x32xf32>
    %32 = arith.mulf %31, %1 : vector<8x32xf32>
    %cst_21 = arith.constant dense<0.000000e+00> : vector<8x32xf32>
    %33 = tpu.matmul %32, %7, %cst_21 {dimension_numbers = #tpu.dot_dimension_numbers<[1], [0], [0], [1], [0, 0, 1, 1], [], []>} : vector<8x32xf32>, vector<32x32xf32>, vector<8x32xf32> -> vector<8x32xf32>
    %34 = vector.broadcast %8 : vector<1x32xf32> to vector<8x32xf32>
    %35 = arith.addf %33, %34 : vector<8x32xf32>
    %36 = arith.mulf %17, %24 : vector<8x32xf32>
    %37 = arith.addf %35, %36 : vector<8x32xf32>
    %cst_22 = arith.constant dense<0.000000e+00> : vector<8x32xf32>
    %38 = tpu.matmul %37, %9, %cst_22 {dimension_numbers = #tpu.dot_dimension_numbers<[1], [0], [0], [1], [0, 0, 1, 1], [], []>} : vector<8x32xf32>, vector<32x32xf32>, vector<8x32xf32> -> vector<8x32xf32>
    %39 = vector.broadcast %10 : vector<1x32xf32> to vector<8x32xf32>
    %40 = arith.addf %38, %39 : vector<8x32xf32>
    %cst_23 = arith.constant 0.000000e+00 : f32
    %41 = vector.broadcast %cst_23 : f32 to vector<8x32xf32>
    %42 = arith.subf %41, %40 : vector<8x32xf32>
    %43 = math.exp %42 : vector<8x32xf32>
    %cst_24 = arith.constant 1.000000e+00 : f32
    %44 = vector.broadcast %cst_24 : f32 to vector<8x32xf32>
    %45 = arith.addf %44, %43 : vector<8x32xf32>
    %46 = tpu.reciprocal %45 : vector<8x32xf32> -> vector<8x32xf32>
    %47 = vector.extract_strided_slice %6 {offsets = [0, 96], sizes = [8, 32], strides = [1, 1]} : vector<8x128xf32> to vector<8x32xf32>
    %cst_25 = arith.constant 0.000000e+00 : f32
    %48 = vector.broadcast %cst_25 : f32 to vector<8x32xf32>
    %49 = arith.subf %48, %47 : vector<8x32xf32>
    %50 = math.exp %49 : vector<8x32xf32>
    %cst_26 = arith.constant 1.000000e+00 : f32
    %51 = vector.broadcast %cst_26 : f32 to vector<8x32xf32>
    %52 = arith.addf %51, %50 : vector<8x32xf32>
    %53 = tpu.reciprocal %52 : vector<8x32xf32> -> vector<8x32xf32>
    %cst_27 = arith.constant 1.000000e+00 : f32
    %54 = vector.broadcast %cst_27 : f32 to vector<8x32xf32>
    %55 = arith.subf %54, %53 : vector<8x32xf32>
    %56 = arith.mulf %55, %1 : vector<8x32xf32>
    %57 = arith.mulf %53, %46 : vector<8x32xf32>
    %58 = arith.addf %56, %57 : vector<8x32xf32>
    %c0_28 = arith.constant 0 : index
    %c0_29 = arith.constant 0 : index
    %59 = vector.load %arg8[%c0_28, %c0_29] : memref<8x32xf32, #tpu.memory_space<vmem>>, vector<8x32xf32>
    tpu.vector_store %arg8[%c0_28, %c0_29], %37 {strides = array<i32>} : memref<8x32xf32, #tpu.memory_space<vmem>>, vector<8x32xf32>,
    %c0_30 = arith.constant 0 : index
    %c0_31 = arith.constant 0 : index
    %60 = vector.load %arg9[%c0_30, %c0_31] : memref<8x32xf32, #tpu.memory_space<vmem>>, vector<8x32xf32>
    tpu.vector_store %arg9[%c0_30, %c0_31], %58 {strides = array<i32>} : memref<8x32xf32, #tpu.memory_space<vmem>>, vector<8x32xf32>,
    return
  }
}

</mosaic_0001>

<bundles_post_ra>
// kernel: tpu_custom_call.1
= control target key start
LH: loop header
LB: loop body
LE: loop exit
PB: predicated region body
PF: predicated region fallthrough
CT: control target
= control target key end

     0   :  { %15 = vsyncpa [#allocation3], 0  ;;  %s843_s0 = inlined_call_operand.vmem [shape: f32[8,48], index: 0, kind: input, shape index: {}]   ;;  %s844_s1 = inlined_call_operand.hbm [shape: f32[8,32], index: 1, kind: input, shape index: {}, may-alias: {1,9}]   ;;  %s845_s2 = inlined_call_operand.hbm [shape: f32[48,128], index: 2, kind: input, shape index: {}]   ;;  %s846_s3 = inlined_call_operand.vmem [shape: f32[1,128], index: 3, kind: input, shape index: {}]   ;;  %s847_s4 = inlined_call_operand.hbm [shape: f32[32,32], index: 4, kind: input, shape index: {}]   ;;  %s848_s5 = inlined_call_operand.vmem [shape: f32[1,32], index: 5, kind: input, shape index: {}]   ;;  %s849_s6 = inlined_call_operand.hbm [shape: f32[32,32], index: 6, kind: input, shape index: {}]   ;;  %s850_s7 = inlined_call_operand.vmem [shape: f32[1,32], index: 7, kind: input, shape index: {}]   ;;  %s851_s8 = inlined_call_operand.hbm [shape: f32[8,32], index: 8, kind: output, shape index: {0}]   ;;  %s852_s9 = inlined_call_operand.hbm [shape: f32[8,32], index: 9, kind: output, shape index: {1}, may-alias: {1,9}]  }
   0x1   :  { %16 = vsyncpa [#allocation6], 0 }
   0x2   :  { %17 = vsyncpa [#allocation9], 0 }
   0x3   :  { %18 = vsyncpa [#allocation4], 0 }
   0x4   :  { %19 = vsyncpa [#allocation12], 0  ;;  %s668_s30 = smov [#allocation5]   ;;  %s526_s13 = scalar_lea.hbm %s845_s2, 768 }
   0x5   :  { %s37_s10 = sshll.u32 %s668_s30, 4  ;;  %p527_p0 = scmp.ne.s32.totalorder %s845_s2, %s526_s13  ;;  %s38_s10 = int_to_ptr.vmem [resolvable:$true] %s37_s10 }
   0x6   :  { %p530_p1 = scmp.lt.u32.totalorder %s526_s13, %s845_s2 }
   0x8   :  { %p532_p2 = pnand %p530_p1, %p527_p0 }
   0xa   :  { %535 = shalt.err (!%p532_p2)
}
   0xb   :  { %s536_s18 = scalar_lea.vmem %s38_s10, 768  ;;  %p541_p4 = scmp.lt.s32.totalorder %s38_s10, %s38_s10 }
   0xc   :  { %p537_p3 = scmp.ne.s32.totalorder %s38_s10, %s536_s18  ;;  %p542_p5 = scmp.lt.s32.totalorder %s536_s18, %s536_s18 }
   0xe   :  { %p543_p6 = por %p542_p5, %p541_p4 }
  0x10   :  { %p544_p7 = pnand %p543_p6, %p537_p3 }
  0x12   :  { %547 = shalt.err (!%p544_p7)
}
  0x13   :  { %s669_s19 = smov 128   ;;  %s670_s20 = smov 8  }
  0x14   :  { %43 = dma.hbm_to_vmem [thread:$0]  %s845_s2, 768, %s38_s10, [#allocation6], %s669_s19, %s669_s19, %s670_s20  }
  0x15   :  { %s671_s23 = smov [#allocation2]   ;;  %s672_s25 = smov [#allocation7]  }
  0x16   :  { %s28_s24 = sshll.u32 %s671_s23, 4  ;;  %s51_s26 = sshll.u32 %s672_s25, 4  ;;  %s29_s24 = int_to_ptr.vmem [resolvable:$true] %s28_s24  ;;  %s52_s26 = int_to_ptr.vmem [resolvable:$true] %s51_s26 }
  0x17   :  { %s548_s29 = scalar_lea.hbm %s844_s1, 128 }
  0x18   :  { %p549_p8 = scmp.ne.s32.totalorder %s844_s1, %s548_s29  ;;  %p552_p9 = scmp.lt.u32.totalorder %s548_s29, %s844_s1 }
  0x1a   :  { %p554_p10 = pnand %p552_p9, %p549_p8 }
  0x1c   :  { %557 = shalt.err (!%p554_p10)
}
  0x1d   :  { %s558_s2 = scalar_lea.vmem %s29_s24, 128  ;;  %p563_p12 = scmp.lt.s32.totalorder %s29_s24, %s29_s24 }
  0x1e   :  { %p559_p11 = scmp.ne.s32.totalorder %s29_s24, %s558_s2  ;;  %p564_p13 = scmp.lt.s32.totalorder %s558_s2, %s558_s2 }
  0x20   :  { %p565_p0 = por %p564_p13, %p563_p12 }
  0x22   :  { %p566_p1 = pnand %p565_p0, %p559_p11 }
  0x24   :  { %569 = shalt.err (!%p566_p1)
}
  0x25   :  { %31 = dma.hbm_to_vmem [thread:$0]  %s844_s1, 128, %s29_s24, [#allocation3]  }
  0x26   :  { %s570_s17 = scalar_lea.hbm %s847_s4, 512 }
  0x27   :  { %p571_p2 = scmp.ne.s32.totalorder %s847_s4, %s570_s17  ;;  %p574_p3 = scmp.lt.u32.totalorder %s570_s17, %s847_s4 }
  0x29   :  { %p576_p4 = pnand %p574_p3, %p571_p2 }
  0x2b   :  { %579 = shalt.err (!%p576_p4)
}
  0x2c   :  { %s580_s25 = scalar_lea.vmem %s52_s26, 512  ;;  %p585_p6 = scmp.lt.s32.totalorder %s52_s26, %s52_s26 }
  0x2d   :  { %p581_p5 = scmp.ne.s32.totalorder %s52_s26, %s580_s25  ;;  %p586_p7 = scmp.lt.s32.totalorder %s580_s25, %s580_s25 }
  0x2f   :  { %p587_p8 = por %p586_p7, %p585_p6 }
  0x31   :  { %p588_p9 = pnand %p587_p8, %p581_p5 }
  0x33   :  { %591 = shalt.err (!%p588_p9)
}
  0x34   :  { %57 = dma.hbm_to_vmem [thread:$0]  %s847_s4, 512, %s52_s26, [#allocation6], %s669_s19, %s669_s19, %s670_s20  }
  0x35   :  { %s673_s27 = smov [#allocation8]   ;;  %s592_s11 = scalar_lea.hbm %s849_s6, 512 }
  0x36   :  { %s65_s28 = sshll.u32 %s673_s27, 4  ;;  %p593_p10 = scmp.ne.s32.totalorder %s849_s6, %s592_s11  ;;  %s66_s28 = int_to_ptr.vmem [resolvable:$true] %s65_s28 }
  0x37   :  { %p596_p11 = scmp.lt.u32.totalorder %s592_s11, %s849_s6 }
  0x39   :  { %p598_p12 = pnand %p596_p11, %p593_p10 }
  0x3b   :  { %601 = shalt.err (!%p598_p12)
}
  0x3c   :  { %s602_s14 = scalar_lea.vmem %s66_s28, 512  ;;  %p607_p0 = scmp.lt.s32.totalorder %s66_s28, %s66_s28 }
  0x3d   :  { %p603_p13 = scmp.ne.s32.totalorder %s66_s28, %s602_s14  ;;  %p608_p1 = scmp.lt.s32.totalorder %s602_s14, %s602_s14 }
  0x3f   :  { %p609_p2 = por %p608_p1, %p607_p0 }
  0x41   :  { %p610_p3 = pnand %p609_p2, %p603_p13 }
  0x43   :  { %613 = shalt.err (!%p610_p3)
}
  0x44   :  { %71 = dma.hbm_to_vmem [thread:$0]  %s849_s6, 512, %s66_s28, [#allocation9], %s669_s19, %s669_s19, %s670_s20  }
  0x45   :  { %658 = dma.done.wait [#allocation3], 128  }
  0x46   :  { %659 = vsyncadd [#allocation3], 4294967168 }
  0x47   :  { %660 = dma.done.wait [#allocation6], 1280  }
  0x48   :  { %661 = vsyncadd [#allocation6], 4294966016 }
  0x49   :  { %662 = dma.done.wait [#allocation9], 512  }
  0x4a   :  { %663 = vsyncadd [#allocation9], 4294966784  ;;  %v674_v0 = vmov 0.0|0.0   ;;  %vm675_vm0 = vmmov 0   ;;  %v676_v1 = vmov 0.0   ;;  %v88_v2 = vld [vmem:[#allocation5] sm:$0xff] }
  0x4b   :  { %481 = vmatprep.subr.bf16.mxu0 %v674_v0  ;;  %456 = vmatprep.mubr.msk.f32.mxu0 %vm675_vm0, %v676_v1  ;;  %v89_v3 = vld [vmem:[#allocation5 + $0x8] sm:$0xff]  ;;  %v90_v4 = vld [vmem:[#allocation5 + $0x10] sm:$0xff]  ;;  %v91_v6 = vld [vmem:[#allocation5 + $0x18] sm:$0xff]  ;;  %s677_s6 = smov 64   ;;  %vm101_vm1 = vcmask 392192   ;;  %vm209_vm2 = vcmask 261120  }
  0x4c   :  { %490 = vmatprep.subr.bf16.mxu1 %v674_v0  ;;  %467 = vmatprep.mubr.msk.f32.mxu1 %vm675_vm0, %v676_v1  ;;  %v482_v5 = vpack.c.bf16 %v89_v3, %v88_v2  ;;  %v87_v7 = vld [vmem:[#allocation2] sm:$0xff]  ;;  %v485_v8 = vpack.c.bf16 %v91_v6, %v90_v4  ;;  %v92_v9 = vld [vmem:[#allocation5 + $0x20] sm:$0xff]  ;;  %v93_v10 = vld [vmem:[#allocation5 + $0x28] sm:$0xff] }
  0x4d   :  { %196 = vrot.lane.b32.xlu0 %v87_v7, %s677_s6  ;;  %v488_v11 = vpack.c.bf16 %v93_v10, %v92_v9  ;;  %v86_v12 = vld [vmem:[%s843_s0] sm:$0xff]  ;;  %v175_v13 = vld [vmem:[#allocation7] sm:$0xff]  ;;  %v177_v15 = vld [vmem:[#allocation7 + $0x10] sm:$0xff]  ;;  %s678_s0 = smov 96  }
  0x4e   :  { %483 = vmatpush3.bf16.msra.mxu0 %v482_v5  ;;  %v176_v14 = vld [vmem:[#allocation7 + $0x8] sm:$0xff]  ;;  %v178_v17 = vld [vmem:[#allocation7 + $0x18] sm:$0xff]  ;;  %v180_v30 = vld [vmem:[#allocation8] sm:$0xff] }
  0x4f   :  { %484 = vmatprep.subr.bf16.mxu0 %v674_v0  ;;  %v491_v16 = vpack.c.bf16 %v176_v14, %v175_v13  ;;  %v494_v18 = vpack.c.bf16 %v178_v17, %v177_v15  ;;  %v420_v19 = vld [vmem:[%s846_s3] ss:$0 sm:$0xff]  ;;  %v182_v34 = vld [vmem:[#allocation8 + $0x10] sm:$0xff]  ;;  %v183_v35 = vld [vmem:[#allocation8 + $0x18] sm:$0xff] }
  0x50   :  { %v181_v31 = vld [vmem:[#allocation8 + $0x8] sm:$0xff]  ;;  %v500_v36 = vpack.c.bf16 %v183_v35, %v182_v34 }
  0x51   :  { %492 = vmatpush3.bf16.msra.mxu1 %v491_v16  ;;  %v497_v32 = vpack.c.bf16 %v181_v31, %v180_v30  ;;  %v423_v41 = vld [vmem:[%s848_s5] ss:$0 sm:$0xff]  ;;  %s679_s5 = smov [#allocation10]  }
  0x52   :  { %486 = vmatpush3.bf16.msra.mxu0 %v485_v8  ;;  %493 = vmatprep.subr.bf16.mxu1 %v674_v0  ;;  %v425_v48 = vld [vmem:[%s850_s7] ss:$0 sm:$0xff]  ;;  %s395_s22 = sshll.u32 %s679_s5, 4  ;;  %s396_s22 = int_to_ptr.vmem [resolvable:$true] %s395_s22 }
  0x53   :  { %487 = vmatprep.subr.bf16.mxu0 %v674_v0  ;;  %s614_s23 = scalar_lea.vmem %s396_s22, 128  ;;  %p619_p5 = scmp.lt.s32.totalorder %s396_s22, %s396_s22 }
  0x54   :  { %p615_p4 = scmp.ne.s32.totalorder %s396_s22, %s614_s23  ;;  %p620_p6 = scmp.lt.s32.totalorder %s614_s23, %s614_s23 }
  0x55   :  { %495 = vmatpush3.bf16.msra.mxu1 %v494_v18 }
  0x56   :  { %489 = vmatpush3.bf16.msra.mxu0 %v488_v11  ;;  %496 = vmatprep.subr.bf16.mxu1 %v674_v0  ;;  %p621_p7 = por %p620_p6, %p619_p5 }
  0x58   :  { %p622_p8 = pnand %p621_p7, %p615_p4 }
  0x59   :  { %457 = vmatmul.mubr.msk.f32.vlgmr.msra.gmra.mrb[0].mxu0 %vm101_vm1, %v86_v12 }
  0xbf   :  { %v197_v27 = vpop.permute.xlu0 %196 }
 0x12c   :  { %v171_v20 = vpop.f32.mrb[0].mxu0 }
 0x12d   :  { %v172_v21 = vadd.f32 %v420_v19, %v171_v20  ;;  %v458_v22 = vpop.f32.mrb[1].mxu0 }
 0x12f   :  { %v190_v23 = vsub.f32 0.0, %v172_v21  ;;  %v186_v37 = vmul.f32 1.442695, %v172_v21  ;;  %vm185_vm3 = vcmp.gt.f32.partialorder %v172_v21, 0.0 }
 0x131   :  { %v191_v24 = vmul.f32 1.442695, %v190_v23 }
 0x133   :  { %516 = vpow2.f32 %v191_v24 }
 0x13d   :  { %v517_v25 = vpop.eup %516 }
 0x13e   :  { %v193_v26 = vadd.f32 1.0, %v517_v25 }
 0x140   :  { %518 = vrcp.f32 %v193_v26 }
 0x141   :  { %520 = vpow2.f32 %v186_v37 }
 0x14a   :  { %v798_v28 = vpop.eup %518 }
 0x14b   :  { %v199_v29 = vmul.f32 %v798_v28, %v197_v27  ;;  %283 = vrot.lane.b32.xlu1 %v798_v28, %s678_s0  ;;  %v521_v38 = vpop.eup %520 }
 0x14c   :  { %v422_v39 = vadd.f32 -1.0, %v521_v38 }
 0x14d   :  { %207 = vrot.lane.b32.xlu0 %v199_v29, %s677_s6 }
 0x14e   :  { %v189_v42 = vsel %vm185_vm3, %v172_v21, %v422_v39 }
 0x14f   :  { %373 = vrot.lane.b32.xlu1 %v87_v7, %s678_s0 }
 0x1bd   :  { %v284_v40 = vpop.permute.xlu1 %283 }
 0x1be   :  { %v286_v44 = vmul.f32 %v284_v40, %v189_v42 }
 0x1bf   :  { %v208_v33 = vpop.permute.xlu0 %207 }
 0x1c0   :  { %468 = vmatmul.mubr.msk.f32.vlgmr.msra.gmra.mrb[0].mxu1 %vm209_vm2, %v208_v33 }
 0x1c1   :  { %498 = vmatpush3.bf16.msra.mxu1 %v497_v32  ;;  %478 = vmatprep.mubr.msk.f32.mxu1 %vm675_vm0, %v676_v1 }
 0x1c2   :  { %499 = vmatprep.subr.bf16.mxu1 %v674_v0 }
 0x1c5   :  { %501 = vmatpush3.bf16.msra.mxu1 %v500_v36 }
 0x293   :  { %v278_v43 = vpop.f32.mrb[0].mxu1 }
 0x294   :  { %v279_v45 = vadd.f32 %v423_v41, %v278_v43  ;;  %v469_v46 = vpop.f32.mrb[1].mxu1 }
 0x296   :  { %v287_v47 = vadd.f32 %v286_v44, %v279_v45 }
 0x298   :  { %383 = vst.msk [vmem:[#allocation10] sm:$0xff] %vm209_vm2, %v287_v47  ;;  %479 = vmatmul.mubr.msk.f32.vlgmr.msra.gmra.mrb[2].mxu1 %vm209_vm2, %v287_v47 }
 0x36b   :  { %v363_v49 = vpop.f32.mrb[2].mxu1 }
 0x36c   :  { %v364_v50 = vadd.f32 %v425_v48, %v363_v49  ;;  %v480_v51 = vpop.f32.mrb[3].mxu1 }
 0x36e   :  { %v367_v52 = vsub.f32 0.0, %v364_v50 }
 0x370   :  { %v368_v53 = vmul.f32 1.442695, %v367_v52 }
 0x372   :  { %522 = vpow2.f32 %v368_v53 }
 0x37c   :  { %v523_v54 = vpop.eup %522 }
 0x37d   :  { %v370_v55 = vadd.f32 1.0, %v523_v54 }
 0x37f   :  { %524 = vrcp.f32 %v370_v55 }
 0x389   :  { %v525_v56 = vpop.eup %524 }
 0x38a   :  { %378 = vrot.lane.b32.xlu0 %v525_v56, %s678_s0 }
 0x38b   :  { %625 = shalt.err (!%p622_p8)
}
 0x38c   :  { %s626_s1 = scalar_lea.hbm %s851_s8, 128 }
 0x38d   :  { %p627_p9 = scmp.ne.s32.totalorder %s851_s8, %s626_s1  ;;  %p630_p10 = scmp.lt.u32.totalorder %s626_s1, %s851_s8 }
 0x38f   :  { %p632_p11 = pnand %p630_p10, %p627_p9 }
 0x391   :  { %635 = shalt.err (!%p632_p11)
}
 0x392   :  { %398 = dma.vmem_to_hbm [thread:$0]  %s396_s22, 128, %s851_s8, [#allocation4]   ;;  %v374_v57 = vpop.permute.xlu1 %373  ;;  %v372_v58 = vsub.f32 1.0, %v798_v28 }
 0x393   :  { %s680_s12 = smov 32   ;;  %s681_s13 = smov [#allocation11]  }
 0x394   :  { %v376_v60 = vmul.f32 %v374_v57, %v372_v58  ;;  %s405_s2 = sshll.u32 %s681_s13, 4  ;;  %s406_s2 = int_to_ptr.vmem [resolvable:$true] %s405_s2 }
 0x395   :  { %s636_s10 = scalar_lea.vmem %s406_s2, 128  ;;  %p641_p13 = scmp.lt.s32.totalorder %s406_s2, %s406_s2 }
 0x396   :  { %p637_p12 = scmp.ne.s32.totalorder %s406_s2, %s636_s10  ;;  %p642_p0 = scmp.lt.s32.totalorder %s636_s10, %s636_s10 }
 0x398   :  { %p643_p1 = por %p642_p0, %p641_p13 }
 0x39a   :  { %p644_p2 = pnand %p643_p1, %p637_p12 }
 0x3fc   :  { %v379_v59 = vpop.permute.xlu0 %378 }
 0x3fd   :  { %v381_v61 = vmul.f32 %v798_v28, %v379_v59 }
 0x3ff   :  { %v382_v62 = vadd.f32 %v381_v61, %v376_v60 }
 0x401   :  { %385 = vrot.lane.b32.xlu1 %v382_v62, %s680_s12 }
 0x473   :  { %v386_v63 = vpop.permute.xlu1 %385 }
 0x474   :  { %388 = vst.msk [vmem:[#allocation11] sm:$0xff] %vm209_vm2, %v386_v63 }
 0x475   :  { %647 = shalt.err (!%p644_p2)
}
 0x476   :  { %s648_s4 = scalar_lea.hbm %s852_s9, 128 }
 0x477   :  { %p649_p3 = scmp.ne.s32.totalorder %s852_s9, %s648_s4  ;;  %p652_p4 = scmp.lt.u32.totalorder %s648_s4, %s852_s9 }
 0x479   :  { %p654_p5 = pnand %p652_p4, %p649_p3 }
 0x47b   :  { %657 = shalt.err (!%p654_p5)
}
 0x47c   :  { %408 = dma.vmem_to_hbm [thread:$0]  %s406_s2, 128, %s852_s9, [#allocation12]  }
 0x47d   :  { %664 = dma.done.wait [#allocation4], 128  }
 0x47e   :  { %665 = vsyncadd [#allocation4], 4294967168 }
 0x47f   :  { %666 = dma.done.wait [#allocation12], 128  }
 0x480   :  { %667 = vsyncadd [#allocation12], 4294967168 }
 0x481   :  { %415 = vsyncpa [#allocation3], 1 }
 0x482   :  { %416 = vsyncpa [#allocation6], 1 }
 0x483   :  { %417 = vsyncpa [#allocation9], 1 }
 0x484   :  { %418 = vsyncpa [#allocation4], 1 }
 0x485   :  { %419 = vsyncpa [#allocation12], 1 }

</bundles_post_ra>
